<compile_context>
chip_gen: v7x
topology: tpu7x:2x2x1
jax: 0.10.0
libtpu: 0.0.40
codegen_flags: <defaults>
</compile_context>

<pallas_src>
import functools

import jax
import jax.numpy as jnp
from jax import lax
from jax.experimental import pallas as pl
from jax.experimental.pallas import tpu as pltpu

_LANES = 128
_TR_MAX = 64          # row-tile cap: keeps register carries spill-free
_UNROLL_FULL = 16     # lane groups <= this -> fully unrolled at trace time


def _cdiv(a, b):
    return -(-a // b)


def _vmem_params():
    """(per-input tile budget bytes, vmem_limit ceiling bytes), per chip gen."""
    try:
        vmem_bytes = int(pltpu.get_tpu_info().vmem_capacity_bytes)
    except Exception:
        vmem_bytes = 64 * 1024 * 1024          # assume the smallest (v7x per-TC)
    if vmem_bytes >= 100 * 1024 * 1024:        # v5e / v6e: 128 MiB VMEM
        return 6 * 1024 * 1024, 64 * 1024 * 1024
    return 4 * 1024 * 1024, 40 * 1024 * 1024   # v7x: 64 MiB VMEM per TC


def _choose_tiling(rows, cols, itemsize, budget_bytes):
    """Pick (TR, TC).  No padding anywhere: ragged tails are masked in-kernel."""
    # Row tile: full dim when small (always legal), else 64 (multiple of 8).
    tr = rows if rows <= _TR_MAX else _TR_MAX

    # Column tile: multiple of 128 lanes (or the whole axis when cols < 128).
    if cols < _LANES:
        return tr, cols
    groups_avail = cols // _LANES
    budget_groups = max(budget_bytes // (itemsize * tr * _LANES), 1)
    tc_groups = min(budget_groups, groups_avail)

    if _cdiv(rows, tr) == 1 and groups_avail >= 2:
        # Only one row tile: split the reduction axis so both TensorCores
        # (v7x megacore) get work and the DMA pipeline has >= 2 steps.
        target_tiles = 4 if groups_avail >= 8 else 2
        tc_groups = min(tc_groups, _cdiv(groups_avail, target_tiles))
    return tr, tc_groups * _LANES


def _make_sdr_kernel(n_groups, chunk, cols, tc):
    """Per-(row-tile, col-tile) partial num/den sums.

    Grid axis 0: row tiles.  Grid axis 1: column (reduction) tiles.  Both are
    "parallel" -- every step writes its own output slot, the wrapper combines.
    """
    need_mask = (cols % tc) != 0           # last column tile is ragged
    unrolled = n_groups <= _UNROLL_FULL

    def kernel(est_ref, ref_ref, num_ref, den_ref):
        tr = ref_ref.shape[0]
        zeros = jnp.zeros((tr, chunk), jnp.float32)

        if need_mask:
            limit = cols - pl.program_id(1) * tc        # valid cols in this tile
            lane = lax.broadcasted_iota(jnp.int32, (1, chunk), 1)

        def contrib(start):
            # One 128-lane group: VPU-only work, no cross-lane reduce.
            r = ref_ref[:, pl.ds(start, chunk)].astype(jnp.float32)
            e = est_ref[:, pl.ds(start, chunk)].astype(jnp.float32)
            if need_mask:
                valid = lane < (limit - start)
                r = jnp.where(valid, r, 0.0)
                e = jnp.where(valid, e, 0.0)
            d = r - e
            return r * r, d * d

        if unrolled:
            # Small tile: fully unroll at trace time (static 128-aligned slices).
            num, den = zeros, zeros
            for g in range(n_groups):
                nn, dd = contrib(g * chunk)
                num = num + nn
                den = den + dd
        else:
            def body(g, carry):
                num, den = carry
                nn, dd = contrib(pl.multiple_of(g * chunk, chunk))
                return num + nn, den + dd

            num, den = lax.fori_loop(0, n_groups, body, (zeros, zeros), unroll=8)

        # Single cross-lane (XLU) reduce per grid step; one tiny store each.
        num_ref[...] = jnp.sum(num, axis=-1, keepdims=True)[None]
        den_ref[...] = jnp.sum(den, axis=-1, keepdims=True)[None]

    return kernel


@functools.partial(jax.jit, static_argnames=("reduction",))
def new_sdr_loss(estimates, references, reduction="mean"):
    """Pallas implementation of NewSDRLoss.forward.

    estimates, references: (B, C, H, W) arrays (any float dtype).
    """
    assert estimates.ndim == 4 and references.ndim == 4, "Inputs must be 4D tensors."
    B, C, H, W = references.shape
    rows, cols = B * C, H * W

    # Stream inputs in their native dtype (no wrapper astype, no padding =>
    # exactly one HBM read per input); the kernel upcasts each 128-lane chunk
    # to f32 so accumulation is always f32.
    est2d = estimates.reshape(rows, cols)
    ref2d = references.reshape(rows, cols)
    itemsize = max(est2d.dtype.itemsize, ref2d.dtype.itemsize)

    budget_bytes, vmem_cap = _vmem_params()
    tr, tc = _choose_tiling(rows, cols, itemsize, budget_bytes)
    row_tiles = _cdiv(rows, tr)
    num_k = _cdiv(cols, tc)
    chunk = _LANES if tc >= _LANES else tc
    n_groups = _cdiv(tc, chunk)

    # VMEM: 2 inputs x 2 pipeline buffers x tile (+ tiny output blocks).
    tile_bytes = tr * tc * itemsize
    vmem_needed = 4 * tile_bytes + 4 * tr * 4
    vmem_limit = int(min(vmem_cap,
                         max(32 * 1024 * 1024, vmem_needed + 16 * 1024 * 1024)))

    part_shape = jax.ShapeDtypeStruct((num_k, rows, 1), jnp.float32)
    out_spec = pl.BlockSpec((1, tr, 1), lambda i, k: (k, i, 0))

    partial_num, partial_den = pl.pallas_call(
        _make_sdr_kernel(n_groups, chunk, cols, tc),
        out_shape=(part_shape, part_shape),
        grid_spec=pltpu.PrefetchScalarGridSpec(
            num_scalar_prefetch=0,
            grid=(row_tiles, num_k),
            in_specs=[
                pl.BlockSpec((tr, tc), lambda i, k: (i, k)),
                pl.BlockSpec((tr, tc), lambda i, k: (i, k)),
            ],
            out_specs=(out_spec, out_spec),
        ),
        compiler_params=pltpu.CompilerParams(
            dimension_semantics=("parallel", "parallel"),
            vmem_limit_bytes=vmem_limit,
        ),
    )(est2d, ref2d)

    # Tiny combine + log10 in the wrapper (exact same math as the reference).
    delta = jnp.float32(1e-07)
    num = jnp.sum(partial_num[:, :, 0], axis=0) + delta
    den = jnp.sum(partial_den[:, :, 0], axis=0) + delta
    scores = (jnp.float32(10.0) * jnp.log10(num / den)).reshape(B, C)

    if reduction == "mean":
        return -jnp.mean(scores)
    elif reduction == "sum":
        return -jnp.sum(scores)
    else:
        return -scores


def _reference_loss(estimates, references, reduction="mean"):
    delta = 1e-07
    r = references.astype(jnp.float32)
    e = estimates.astype(jnp.float32)
    num = jnp.sum(jnp.square(r), axis=(2, 3)) + delta
    den = jnp.sum(jnp.square(r - e), axis=(2, 3)) + delta
    scores = 10.0 * jnp.log10(num / den)
    if reduction == "mean":
        return -jnp.mean(scores)
    elif reduction == "sum":
        return -jnp.sum(scores)
    return -scores


def _check(shape, reduction, key):
    k1, k2 = jax.random.split(key)
    est = jax.random.normal(k1, shape, dtype=jnp.float32)
    ref = jax.random.normal(k2, shape, dtype=jnp.float32)
    out = jax.block_until_ready(new_sdr_loss(est, ref, reduction=reduction))
    exp = _reference_loss(est, ref, reduction=reduction)
    assert jnp.allclose(out, exp, rtol=1e-5, atol=1e-4), (shape, reduction, out, exp)


if __name__ == "__main__":
    key = jax.random.PRNGKey(0)
    keys = jax.random.split(key, 5)

    # Primary shape implied by the module: (B, C, H, W) = (2, 4, 16, 16).
    _check((2, 4, 16, 16), "mean", keys[0])
    # Non-lane-aligned spatial size -> in-kernel tail masking, 'none' reduce.
    _check((2, 4, 10, 13), "none", keys[1])
    # Multiple column tiles with a ragged last tile, 'sum' reduce.
    _check((4, 4, 48, 48), "sum", keys[2])
    # rows = B*C > 64 -> two row tiles with a partial last row block.
    _check((8, 9, 16, 16), "none", keys[3])
    # Large column tile -> rolled fori_loop path + 4 parallel column tiles.
    _check((2, 4, 96, 96), "mean", keys[4])

    print("KERNEL_OK")
</pallas_src>

<mosaic_0001>
module attributes {stable_mosaic.version = 11 : i64} {
  func.func @kernel(%arg0: i32, %arg1: i32, %arg2: memref<8x128xf32, #tpu.memory_space<vmem>>, %arg3: memref<8x128xf32, #tpu.memory_space<vmem>>, %arg4: memref<1x8x1xf32, #tpu.memory_space<vmem>>, %arg5: memref<1x8x1xf32, #tpu.memory_space<vmem>>) attributes {dimension_semantics = [#tpu.dimension_semantics<parallel>, #tpu.dimension_semantics<parallel>], iteration_bounds = array<i64: 1, 2>, scalar_prefetch = 0 : i64, scratch_operands = 0 : i64, tpu.core_type = #tpu.core_type<tc>, window_params = [{transform_indices = @transform_0, window_bounds = array<i64: 8, 128>}, {transform_indices = @transform_1, window_bounds = array<i64: 8, 128>}, {transform_indices = @transform_2, window_bounds = array<i64: 1, 8, 1>}, {transform_indices = @transform_3, window_bounds = array<i64: 1, 8, 1>}]} {
    %cst = arith.constant 0.000000e+00 : f32
    %0 = vector.broadcast %cst : f32 to vector<8x128xf32>
    %c0 = arith.constant 0 : index
    %c0_0 = arith.constant 0 : index
    %1 = vector.load %arg3[%c0, %c0_0] : memref<8x128xf32, #tpu.memory_space<vmem>>, vector<8x128xf32>
    %c0_1 = arith.constant 0 : index
    %c0_2 = arith.constant 0 : index
    %2 = vector.load %arg2[%c0_1, %c0_2] : memref<8x128xf32, #tpu.memory_space<vmem>>, vector<8x128xf32>
    %3 = arith.subf %1, %2 : vector<8x128xf32>
    %4 = arith.mulf %1, %1 : vector<8x128xf32>
    %5 = arith.mulf %3, %3 : vector<8x128xf32>
    %6 = arith.addf %0, %4 : vector<8x128xf32>
    %7 = arith.addf %0, %5 : vector<8x128xf32>
    %cst_3 = arith.constant dense<0.000000e+00> : vector<8xf32>
    %8 = vector.multi_reduction <add>, %6, %cst_3 [1] : vector<8x128xf32> to vector<8xf32>
    %9 = vector.shape_cast %8 : vector<8xf32> to vector<8x1xf32>
    %10 = vector.shape_cast %9 : vector<8x1xf32> to vector<1x8x1xf32>
    %c0_4 = arith.constant 0 : index
    %c0_5 = arith.constant 0 : index
    %c0_6 = arith.constant 0 : index
    %11 = vector.load %arg4[%c0_4, %c0_5, %c0_6] : memref<1x8x1xf32, #tpu.memory_space<vmem>>, vector<1x8x1xf32>
    tpu.vector_store %arg4[%c0_4, %c0_5, %c0_6], %10 {strides = array<i32>} : memref<1x8x1xf32, #tpu.memory_space<vmem>>, vector<1x8x1xf32>,
    %cst_7 = arith.constant dense<0.000000e+00> : vector<8xf32>
    %12 = vector.multi_reduction <add>, %7, %cst_7 [1] : vector<8x128xf32> to vector<8xf32>
    %13 = vector.shape_cast %12 : vector<8xf32> to vector<8x1xf32>
    %14 = vector.shape_cast %13 : vector<8x1xf32> to vector<1x8x1xf32>
    %c0_8 = arith.constant 0 : index
    %c0_9 = arith.constant 0 : index
    %c0_10 = arith.constant 0 : index
    %15 = vector.load %arg5[%c0_8, %c0_9, %c0_10] : memref<1x8x1xf32, #tpu.memory_space<vmem>>, vector<1x8x1xf32>
    tpu.vector_store %arg5[%c0_8, %c0_9, %c0_10], %14 {strides = array<i32>} : memref<1x8x1xf32, #tpu.memory_space<vmem>>, vector<1x8x1xf32>,
    return
  }
  func.func @transform_0(%arg0: i32, %arg1: i32) -> (i32, i32) {
    %c0_i32 = arith.constant 0 : i32
    return %arg0, %arg1 : i32, i32
  }
  func.func @transform_1(%arg0: i32, %arg1: i32) -> (i32, i32) {
    %c0_i32 = arith.constant 0 : i32
    return %arg0, %arg1 : i32, i32
  }
  func.func @transform_2(%arg0: i32, %arg1: i32) -> (i32, i32, i32) {
    %c0_i32 = arith.constant 0 : i32
    %c0_i32_0 = arith.constant 0 : i32
    return %arg1, %arg0, %c0_i32 : i32, i32, i32
  }
  func.func @transform_3(%arg0: i32, %arg1: i32) -> (i32, i32, i32) {
    %c0_i32 = arith.constant 0 : i32
    %c0_i32_0 = arith.constant 0 : i32
    return %arg1, %arg0, %c0_i32 : i32, i32, i32
  }
}

</mosaic_0001>

<bundles_post_ra>
// kernel: new_sdr_loss.1
= control target key start
LH: loop header
LB: loop body
LE: loop exit
PB: predicated region body
PF: predicated region fallthrough
CT: control target
= control target key end

     0   :  { %s479_s12 = smov 0   ;;  %s481_s13 = smov 0   ;;  %s515_s0 = inlined_call_operand.vmem [shape: f32[8,256], index: 0, kind: input, shape index: {}]   ;;  %s516_s1 = inlined_call_operand.vmem [shape: f32[8,256], index: 1, kind: input, shape index: {}]   ;;  %s517_s2 = inlined_call_operand.vmem [shape: f32[2,8,1], index: 2, kind: output, shape index: {0}]   ;;  %s518_s3 = inlined_call_operand.vmem [shape: f32[2,8,1], index: 3, kind: output, shape index: {1}]  }
   0x1   :  { %s483_s14 = smov 0  }
   0x2 LB: > { %s23_s15 = sadd.s32 1, %s453_s13  ;;  %p404_p0 = scmp.ge.s32.totalorder %s457_s14, 1  ;;  %s457_s14 = sphi %s483_s14, %s14_s14   ;;  %s453_s13 = sphi %s481_s13, %s520_s13   ;;  %s449_s12 = sphi %s479_s12, %s519_s12  }
   0x3   : > { %p24_p1 = scmp.ge.s32.totalorder %s23_s15, 2  ;;  %p176_p2 = scmp.lt.s32.totalorder %s457_s14, 3 }
   0x5   : > { %s522_s15 = smov (%p24_p1, %s23_s15), 0  ;;  %p177_p3 = pnand %p404_p0, %p176_p2 }
   0x6   : > { %p222_p4 = scmp.lt.s32.totalorder (!%p177_p3), %s449_s12, 1  ;;  %vm259_vm0 = vcmask (!%p177_p3), 7168  }
   0x7   : > { %180 = sbr.rel (%p177_p3) target bundleno = 167 (0xa7), region = 28 }
   0xe   : > { %s524_s12 = smov (!%p222_p4, %s449_s12), 1 }
   0xf   : > { %s405_s16 = sshll.u32 %s524_s12, 3 }
  0x10   : > { %s235_s19 = scalar_lea.vmem %s516_s1, %s405_s16  ;;  %s227_s22 = scalar_lea.vmem %s515_s0, %s405_s16 }
  0x11   : > { %v250_v0 = vld [vmem:[%s235_s19] sm:$0xff]  ;;  %s242_s25 = scalar_lea.vmem %s517_s2, %s405_s16  ;;  %s249_s28 = scalar_lea.vmem %s518_s3, %s405_s16 }
  0x12   : > { %v251_v1 = vld [vmem:[%s227_s22] sm:$0xff]  ;;  %v253_v2 = vmul.f32 %v250_v0, %v250_v0 }
  0x13   : > { %v252_v3 = vsub.f32 %v250_v0, %v251_v1 }
  0x14   : > { %257 = vadd.xlane.f32.xlu0 %v253_v2 }
  0x15   : > { %v254_v4 = vmul.f32 %v252_v3, %v252_v3 }
  0x18   : > { %261 = vadd.xlane.f32.xlu0 %v254_v4 }
  0xa1   : > { %v258_v5 = vpop.xlane.xlu0 %257 }
  0xa2   : > { %260 = vst.msk [vmem:[%s242_s25] sm:$0xff] %vm259_vm0, %v258_v5 }
  0xa5   : > { %v262_v6 = vpop.xlane.xlu0 %261 }
  0xa6   : > { %263 = vst.msk [vmem:[%s249_s28] sm:$0xff] %vm259_vm0, %v262_v6 }
  0xa7 PF: > { %s14_s14 = sadd.s32 1, %s457_s14   ;;  %s519_s12 = smov %s453_s13 }
  0xa8   : > { %p11_p5 = scmp.ge.s32.totalorder %s14_s14, 4   ;;  %s520_s13 = smov %s522_s15 }
  0xaa   :  { %13 = sbr.rel (!%p11_p5) target bundleno = 2 (0x2), region = 73 }

</bundles_post_ra>
